<compile_context>
chip_gen: v7x
topology: tpu7x:2x2x1
jax: 0.10.0
libtpu: 0.0.40
codegen_flags: <defaults>
</compile_context>

<pallas_src>
import functools

import numpy as np
import jax
import jax.numpy as jnp
from jax import lax
from jax.experimental import pallas as pl
from jax.experimental.pallas import tpu as pltpu


def _round_up(x, m):
    return (x + m - 1) // m * m


def _ajs_kernel(*refs, weights, scale_over_c, n_valid, tile_rows, width):
    """refs = (hot_ref, pred_ref_0..P-1, out_ref, acc_ref).

    All blocks are (tile_rows, width) in the lane-packed layout: lane l of
    packed row r holds logical batch row r*(width//C) + l//C, class l % C,
    i.e. flat element index r*width + l of the original (N, C) arrays.
    """
    hot_ref = refs[0]
    pred_refs = refs[1:-2]
    out_ref = refs[-2]
    acc_ref = refs[-1]

    step = pl.program_id(0)

    @pl.when(step == 0)
    def _():
        acc_ref[...] = jnp.zeros_like(acc_ref)

    # Weighted mean distribution, starting from the one-hot target term.
    # (The one-hot entropy term d*log(d) is identically zero, so only the
    # prediction heads contribute to the entropy sum below.)
    mean_d = jnp.float32(weights[0]) * hot_ref[...].astype(jnp.float32)

    # Stream heads in native dtype: sigmoid via tanh (1 EUP push) plus one log
    # per head for the w_p * sig_p * log(max(sig_p, 1e-7)) entropy term.
    ent = None
    for p, pred_ref in enumerate(pred_refs):
        x = pred_ref[...].astype(jnp.float32)
        sig = 0.5 * jnp.tanh(0.5 * x) + 0.5
        w = jnp.float32(weights[p + 1])
        mean_d = mean_d + w * sig
        term = (w * sig) * jnp.log(jnp.maximum(sig, 1e-7))
        ent = term if ent is None else ent + term

    cross = mean_d * jnp.log(jnp.clip(mean_d, 1e-7, 1.0))
    contrib = ent - cross                                  # (tile_rows, width)

    # Lane-parallel accumulation; interior tiles skip masking entirely.
    row0 = step * tile_rows
    is_full = (row0 + tile_rows) * width <= n_valid

    @pl.when(is_full)
    def _():
        acc_ref[...] = acc_ref[...] + contrib

    @pl.when(jnp.logical_not(is_full))
    def _():
        # Boundary tile: mask batch padding and OOB block padding (which may
        # contain NaN garbage) with a where on the flat element index.
        rows = lax.broadcasted_iota(jnp.int32, (tile_rows, width), 0)
        lanes = lax.broadcasted_iota(jnp.int32, (tile_rows, width), 1)
        flat = (row0 + rows) * width + lanes
        acc_ref[...] = acc_ref[...] + jnp.where(flat < n_valid, contrib,
                                                jnp.float32(0.0))

    @pl.when(step == pl.num_programs(0) - 1)
    def _():
        # Single cross-lane reduction at the very end; scale and 1/C folded
        # into one compile-time constant.  The (8,128) output is written once.
        total = jnp.sum(acc_ref[...]) * jnp.float32(scale_over_c)
        out_ref[...] = jnp.broadcast_to(total, out_ref.shape).astype(out_ref.dtype)


def ajs_loss(pred, labels, *, num_classes, weight_target, weights):
    """Pallas implementation of AJS_loss.forward (scaled=True)."""
    if not isinstance(pred, (list, tuple)):
        pred = [pred]
    pred = list(pred)
    assert len(pred) >= 1
    all_w = tuple([float(weight_target)] + [float(w) for w in weights])
    assert len(all_w) == len(pred) + 1
    scale = float(-1.0 / ((1.0 - all_w[0]) * np.log(1.0 - all_w[0])))

    n, c = pred[0].shape
    assert c == num_classes
    for q in pred:
        assert q.shape == (n, c)

    # --- lane-dense packing ------------------------------------------------
    # Fold g = max(1, 128 // C) batch rows into the lane axis; with C | 128
    # every block is (tn, 128) and fully lane-dense.  The reshape is a
    # zero-copy row-major reinterpret when N % g == 0; otherwise the inputs
    # are padded with zeros (padded rows are masked in-kernel).
    g = max(1, 128 // c)
    w_lanes = g * c
    n_pad = _round_up(n, g)
    r = n_pad // g                                     # packed rows

    labels_i = labels.astype(jnp.int32)
    if n_pad != n:
        labels_i = jnp.pad(labels_i, (0, n_pad - n))
        pred = [jnp.pad(q, ((0, n_pad - n), (0, 0))) for q in pred]

    class_ids = jnp.arange(c, dtype=jnp.int32)[None, :]
    hot = (labels_i[:, None] == class_ids).astype(jnp.int8).reshape(r, w_lanes)
    pred_packed = [q.reshape(r, w_lanes) for q in pred]

    # --- generation-aware tile sizing ---------------------------------------
    # ~1/3 of physical VMEM for tiles (≈21 MiB on v7x's 64 MiB, up to 40 MiB
    # on v5e/v6e's 128 MiB); raise the scoped limit explicitly with headroom.
    try:
        info = pltpu.get_tpu_info()
        vmem_cap = int(getattr(info, "vmem_capacity_bytes", 64 * 1024 * 1024))
    except Exception:
        vmem_cap = 64 * 1024 * 1024
    budget = min(vmem_cap // 3, 40 * 1024 * 1024)
    vmem_limit = int(min((vmem_cap * 3) // 4, 100 * 1024 * 1024))

    bytes_per_row = sum(2 * w_lanes * q.dtype.itemsize for q in pred_packed)
    bytes_per_row += 2 * w_lanes * 1                   # int8 one-hot, double-buffered
    bytes_per_row += w_lanes * 4                       # full-tile accumulator
    bytes_per_row += 6 * w_lanes * 4                   # f32 intermediates headroom
    tn = budget // max(bytes_per_row, 1)
    tn = max(32, min(2048, (tn // 32) * 32))           # 32-row multiples (int8 tiling)
    tn = min(tn, _round_up(r, 32))

    grid_steps = pl.cdiv(r, tn)

    kernel = functools.partial(
        _ajs_kernel,
        weights=all_w,
        scale_over_c=scale / float(c),
        n_valid=n * c,
        tile_rows=tn,
        width=w_lanes,
    )

    in_specs = [pl.BlockSpec((tn, w_lanes), lambda i: (i, 0))]
    in_specs += [pl.BlockSpec((tn, w_lanes), lambda i: (i, 0)) for _ in pred_packed]

    # NOTE: default double-buffering is kept; with these tile sizes the kernel
    # is EUP-/HBM-balanced and deeper pl.Buffered(3) only costs VMEM on v7x.
    out = pl.pallas_call(
        kernel,
        out_shape=jax.ShapeDtypeStruct((8, 128), jnp.float32),
        grid=(grid_steps,),
        in_specs=in_specs,
        out_specs=pl.BlockSpec((8, 128), lambda i: (0, 0)),
        scratch_shapes=[pltpu.VMEM((tn, w_lanes), jnp.float32)],
        compiler_params=pltpu.CompilerParams(
            dimension_semantics=("arbitrary",),
            vmem_limit_bytes=vmem_limit),
    )(hot, *pred_packed)

    return out[0, 0]


def _ajs_loss_ref(pred, labels, *, num_classes, weight_target, weights):
    """Pure-JAX reference mirroring the PyTorch module."""
    if not isinstance(pred, (list, tuple)):
        pred = [pred]
    all_w = [float(weight_target)] + [float(w) for w in weights]
    scale = -1.0 / ((1.0 - all_w[0]) * np.log(1.0 - all_w[0]))

    preds = [jax.nn.sigmoid(p.astype(jnp.float32)) for p in pred]
    onehot = jax.nn.one_hot(labels, num_classes, dtype=jnp.float32)
    distribs = [onehot] + preds
    mean_d = sum(w * d for w, d in zip(all_w, distribs))
    mean_log = jnp.log(jnp.clip(mean_d, 1e-7, 1.0))

    def ckl(prediction, target):
        pos = target * (jnp.log(jnp.maximum(target, 1e-7)) - prediction)
        out = jnp.where(target > 0, pos, jnp.zeros_like(pos))
        return jnp.mean(jnp.sum(out, axis=0))

    jsw = sum(w * ckl(mean_log, d) for w, d in zip(all_w, distribs))
    return scale * jsw


if __name__ == "__main__":
    num_classes = 16
    weight_target = 0.5
    weights = [0.3, 0.2]  # two prediction heads

    key = jax.random.PRNGKey(0)
    keys = jax.random.split(key, 9)

    def make_case(k0, k1, k2, batch):
        p0 = jax.random.normal(k0, (batch, num_classes), dtype=jnp.float32)
        p1 = jax.random.normal(k1, (batch, num_classes), dtype=jnp.float32)
        lab = jax.random.randint(k2, (batch,), 0, num_classes, dtype=jnp.int32)
        return p0, p1, lab

    # 1) Tiny case: single packed row, block bigger than the array, so the
    #    boundary masking path sanitizes the OOB rows.
    p0, p1, lab = make_case(keys[0], keys[1], keys[2], 8)
    got = jax.block_until_ready(
        ajs_loss([p0, p1], lab, num_classes=num_classes,
                 weight_target=weight_target, weights=weights))
    ref = _ajs_loss_ref([p0, p1], lab, num_classes=num_classes,
                        weight_target=weight_target, weights=weights)
    np.testing.assert_allclose(np.asarray(got), np.asarray(ref),
                               rtol=1e-4, atol=1e-4)

    # 2) Ragged batch (2500 % 8 != 0): exercises the wrapper pad and the
    #    in-kernel flat-index masking of the padded logical rows.
    p0, p1, lab = make_case(keys[3], keys[4], keys[5], 2500)
    got = jax.block_until_ready(
        ajs_loss([p0, p1], lab, num_classes=num_classes,
                 weight_target=weight_target, weights=weights))
    ref = _ajs_loss_ref([p0, p1], lab, num_classes=num_classes,
                        weight_target=weight_target, weights=weights)
    np.testing.assert_allclose(np.asarray(got), np.asarray(ref),
                               rtol=5e-4, atol=1e-3)

    # 3) Multi-block grid: interior fast-path (unmasked) blocks plus one
    #    boundary block, accumulator carried across grid steps.
    p0, p1, lab = make_case(keys[6], keys[7], keys[8], 36000)
    got = jax.block_until_ready(
        ajs_loss([p0, p1], lab, num_classes=num_classes,
                 weight_target=weight_target, weights=weights))
    ref = _ajs_loss_ref([p0, p1], lab, num_classes=num_classes,
                        weight_target=weight_target, weights=weights)
    np.testing.assert_allclose(np.asarray(got), np.asarray(ref),
                               rtol=5e-4, atol=1e-2)

    print("KERNEL_OK")
</pallas_src>

<mosaic_0001>
module attributes {stable_mosaic.version = 11 : i64} {
  func.func @_ajs_kernel(%arg0: i32, %arg1: memref<32x128xi8, #tpu.memory_space<vmem>>, %arg2: memref<32x128xf32, #tpu.memory_space<vmem>>, %arg3: memref<32x128xf32, #tpu.memory_space<vmem>>, %arg4: memref<8x128xf32, #tpu.memory_space<vmem>>, %arg5: memref<32x128xf32, #tpu.memory_space<vmem>>) attributes {dimension_semantics = [#tpu.dimension_semantics<arbitrary>], iteration_bounds = array<i64: 1>, scalar_prefetch = 0 : i64, scratch_operands = 1 : i64, tpu.core_type = #tpu.core_type<tc>, window_params = [{transform_indices = @transform_0, window_bounds = array<i64: 32, 128>}, {transform_indices = @transform_1, window_bounds = array<i64: 32, 128>}, {transform_indices = @transform_2, window_bounds = array<i64: 32, 128>}, {pipeline_mode = #tpu.pipeline_mode<synchronous>, transform_indices = @transform_3, window_bounds = array<i64: 8, 128>}]} {
    %c0_i32 = arith.constant 0 : i32
    %0 = arith.cmpi eq, %arg0, %c0_i32 : i32
    %1 = arith.extui %0 : i1 to i32
    %c0_i32_0 = arith.constant 0 : i32
    %2 = arith.cmpi ne, %1, %c0_i32_0 : i32
    scf.if %2 {
      %cst_26 = arith.constant 0.000000e+00 : f32
      %61 = vector.broadcast %cst_26 : f32 to vector<32x128xf32>
      %c0_27 = arith.constant 0 : index
      %c0_28 = arith.constant 0 : index
      %62 = vector.load %arg5[%c0_27, %c0_28] : memref<32x128xf32, #tpu.memory_space<vmem>>, vector<32x128xf32>
      tpu.vector_store %arg5[%c0_27, %c0_28], %61 {strides = array<i32>} : memref<32x128xf32, #tpu.memory_space<vmem>>, vector<32x128xf32>,
    } else {
    }
    %c0 = arith.constant 0 : index
    %c0_1 = arith.constant 0 : index
    %3 = vector.load %arg1[%c0, %c0_1] : memref<32x128xi8, #tpu.memory_space<vmem>>, vector<32x128xi8>
    %4 = arith.sitofp %3 : vector<32x128xi8> to vector<32x128xf32>
    %cst = arith.constant 5.000000e-01 : f32
    %5 = vector.broadcast %cst : f32 to vector<32x128xf32>
    %6 = arith.mulf %5, %4 : vector<32x128xf32>
    %c0_2 = arith.constant 0 : index
    %c0_3 = arith.constant 0 : index
    %7 = vector.load %arg2[%c0_2, %c0_3] : memref<32x128xf32, #tpu.memory_space<vmem>>, vector<32x128xf32>
    %cst_4 = arith.constant 5.000000e-01 : f32
    %8 = vector.broadcast %cst_4 : f32 to vector<32x128xf32>
    %9 = arith.mulf %8, %7 : vector<32x128xf32>
    %10 = math.tanh %9 : vector<32x128xf32>
    %cst_5 = arith.constant 5.000000e-01 : f32
    %11 = vector.broadcast %cst_5 : f32 to vector<32x128xf32>
    %12 = arith.mulf %11, %10 : vector<32x128xf32>
    %cst_6 = arith.constant 5.000000e-01 : f32
    %13 = vector.broadcast %cst_6 : f32 to vector<32x128xf32>
    %14 = arith.addf %12, %13 : vector<32x128xf32>
    %cst_7 = arith.constant 3.000000e-01 : f32
    %15 = vector.broadcast %cst_7 : f32 to vector<32x128xf32>
    %16 = arith.mulf %15, %14 : vector<32x128xf32>
    %17 = arith.addf %6, %16 : vector<32x128xf32>
    %cst_8 = arith.constant 3.000000e-01 : f32
    %18 = vector.broadcast %cst_8 : f32 to vector<32x128xf32>
    %19 = arith.mulf %18, %14 : vector<32x128xf32>
    %cst_9 = arith.constant 1.000000e-07 : f32
    %20 = vector.broadcast %cst_9 : f32 to vector<32x128xf32>
    %21 = arith.maximumf %14, %20 : vector<32x128xf32>
    %22 = math.log %21 : vector<32x128xf32>
    %23 = arith.mulf %19, %22 : vector<32x128xf32>
    %c0_10 = arith.constant 0 : index
    %c0_11 = arith.constant 0 : index
    %24 = vector.load %arg3[%c0_10, %c0_11] : memref<32x128xf32, #tpu.memory_space<vmem>>, vector<32x128xf32>
    %cst_12 = arith.constant 5.000000e-01 : f32
    %25 = vector.broadcast %cst_12 : f32 to vector<32x128xf32>
    %26 = arith.mulf %25, %24 : vector<32x128xf32>
    %27 = math.tanh %26 : vector<32x128xf32>
    %cst_13 = arith.constant 5.000000e-01 : f32
    %28 = vector.broadcast %cst_13 : f32 to vector<32x128xf32>
    %29 = arith.mulf %28, %27 : vector<32x128xf32>
    %cst_14 = arith.constant 5.000000e-01 : f32
    %30 = vector.broadcast %cst_14 : f32 to vector<32x128xf32>
    %31 = arith.addf %29, %30 : vector<32x128xf32>
    %cst_15 = arith.constant 2.000000e-01 : f32
    %32 = vector.broadcast %cst_15 : f32 to vector<32x128xf32>
    %33 = arith.mulf %32, %31 : vector<32x128xf32>
    %34 = arith.addf %17, %33 : vector<32x128xf32>
    %cst_16 = arith.constant 2.000000e-01 : f32
    %35 = vector.broadcast %cst_16 : f32 to vector<32x128xf32>
    %36 = arith.mulf %35, %31 : vector<32x128xf32>
    %cst_17 = arith.constant 1.000000e-07 : f32
    %37 = vector.broadcast %cst_17 : f32 to vector<32x128xf32>
    %38 = arith.maximumf %31, %37 : vector<32x128xf32>
    %39 = math.log %38 : vector<32x128xf32>
    %40 = arith.mulf %36, %39 : vector<32x128xf32>
    %41 = arith.addf %23, %40 : vector<32x128xf32>
    %cst_18 = arith.constant 1.000000e-07 : f32
    %cst_19 = arith.constant 1.000000e+00 : f32
    %42 = vector.broadcast %cst_18 : f32 to vector<32x128xf32>
    %43 = arith.maximumf %42, %34 : vector<32x128xf32>
    %44 = vector.broadcast %cst_19 : f32 to vector<32x128xf32>
    %45 = arith.minimumf %44, %43 : vector<32x128xf32>
    %46 = math.log %45 : vector<32x128xf32>
    %47 = arith.mulf %34, %46 : vector<32x128xf32>
    %48 = arith.subf %41, %47 : vector<32x128xf32>
    %c32_i32 = arith.constant 32 : i32
    %49 = arith.muli %arg0, %c32_i32 : i32
    %c32_i32_20 = arith.constant 32 : i32
    %50 = arith.addi %49, %c32_i32_20 : i32
    %c128_i32 = arith.constant 128 : i32
    %51 = arith.muli %50, %c128_i32 : i32
    %c128_i32_21 = arith.constant 128 : i32
    %52 = arith.cmpi sle, %51, %c128_i32_21 : i32
    %53 = arith.extui %52 : i1 to i32
    %c0_i32_22 = arith.constant 0 : i32
    %54 = arith.cmpi ne, %53, %c0_i32_22 : i32
    scf.if %54 {
      %c0_26 = arith.constant 0 : index
      %c0_27 = arith.constant 0 : index
      %61 = vector.load %arg5[%c0_26, %c0_27] : memref<32x128xf32, #tpu.memory_space<vmem>>, vector<32x128xf32>
      %62 = arith.addf %61, %48 : vector<32x128xf32>
      %c0_28 = arith.constant 0 : index
      %c0_29 = arith.constant 0 : index
      %63 = vector.load %arg5[%c0_28, %c0_29] : memref<32x128xf32, #tpu.memory_space<vmem>>, vector<32x128xf32>
      tpu.vector_store %arg5[%c0_28, %c0_29], %62 {strides = array<i32>} : memref<32x128xf32, #tpu.memory_space<vmem>>, vector<32x128xf32>,
    } else {
    }
    %true = arith.constant true
    %55 = arith.xori %52, %true : i1
    %56 = arith.extui %55 : i1 to i32
    %c0_i32_23 = arith.constant 0 : i32
    %57 = arith.cmpi ne, %56, %c0_i32_23 : i32
    scf.if %57 {
      %61 = tpu.iota {dimensions = array<i32: 0>} : vector<32x128xi32>
      %62 = tpu.iota {dimensions = array<i32: 1>} : vector<32x128xi32>
      %63 = vector.broadcast %49 : i32 to vector<32x128xi32>
      %64 = arith.addi %63, %61 : vector<32x128xi32>
      %c128_i32_26 = arith.constant 128 : i32
      %65 = vector.broadcast %c128_i32_26 : i32 to vector<32x128xi32>
      %66 = arith.muli %64, %65 : vector<32x128xi32>
      %67 = arith.addi %66, %62 : vector<32x128xi32>
      %c0_27 = arith.constant 0 : index
      %c0_28 = arith.constant 0 : index
      %68 = vector.load %arg5[%c0_27, %c0_28] : memref<32x128xf32, #tpu.memory_space<vmem>>, vector<32x128xf32>
      %c128_i32_29 = arith.constant 128 : i32
      %69 = vector.broadcast %c128_i32_29 : i32 to vector<32x128xi32>
      %70 = arith.cmpi slt, %67, %69 : vector<32x128xi32>
      %cst_30 = arith.constant 0.000000e+00 : f32
      %71 = vector.broadcast %cst_30 : f32 to vector<32x128xf32>
      %72 = arith.select %70, %48, %71 : vector<32x128xi1>, vector<32x128xf32>
      %73 = arith.addf %68, %72 : vector<32x128xf32>
      %c0_31 = arith.constant 0 : index
      %c0_32 = arith.constant 0 : index
      %74 = vector.load %arg5[%c0_31, %c0_32] : memref<32x128xf32, #tpu.memory_space<vmem>>, vector<32x128xf32>
      tpu.vector_store %arg5[%c0_31, %c0_32], %73 {strides = array<i32>} : memref<32x128xf32, #tpu.memory_space<vmem>>, vector<32x128xf32>,
    } else {
    }
    %c0_i32_24 = arith.constant 0 : i32
    %58 = arith.cmpi eq, %arg0, %c0_i32_24 : i32
    %59 = arith.extui %58 : i1 to i32
    %c0_i32_25 = arith.constant 0 : i32
    %60 = arith.cmpi ne, %59, %c0_i32_25 : i32
    scf.if %60 {
      %c0_26 = arith.constant 0 : index
      %c0_27 = arith.constant 0 : index
      %61 = vector.load %arg5[%c0_26, %c0_27] : memref<32x128xf32, #tpu.memory_space<vmem>>, vector<32x128xf32>
      %62 = vector.shape_cast %61 : vector<32x128xf32> to vector<1x32x128xf32>
      %cst_28 = arith.constant dense<0.000000e+00> : vector<1xf32>
      %63 = vector.multi_reduction <add>, %62, %cst_28 [1, 2] : vector<1x32x128xf32> to vector<1xf32>
      %64 = vector.shape_cast %63 : vector<1xf32> to vector<1x1x1xf32>
      %65 = vector.extract %64[0, 0, 0] : f32 from vector<1x1x1xf32>
      %cst_29 = arith.constant 0.180336878 : f32
      %66 = arith.mulf %65, %cst_29 : f32
      %67 = vector.broadcast %66 : f32 to vector<8x128xf32>
      %c0_30 = arith.constant 0 : index
      %c0_31 = arith.constant 0 : index
      %68 = vector.load %arg4[%c0_30, %c0_31] : memref<8x128xf32, #tpu.memory_space<vmem>>, vector<8x128xf32>
      tpu.vector_store %arg4[%c0_30, %c0_31], %67 {strides = array<i32>} : memref<8x128xf32, #tpu.memory_space<vmem>>, vector<8x128xf32>,
    } else {
    }
    return
  }
  func.func @transform_0(%arg0: i32) -> (i32, i32) {
    %c0_i32 = arith.constant 0 : i32
    %c0_i32_0 = arith.constant 0 : i32
    return %arg0, %c0_i32 : i32, i32
  }
  func.func @transform_1(%arg0: i32) -> (i32, i32) {
    %c0_i32 = arith.constant 0 : i32
    %c0_i32_0 = arith.constant 0 : i32
    return %arg0, %c0_i32 : i32, i32
  }
  func.func @transform_2(%arg0: i32) -> (i32, i32) {
    %c0_i32 = arith.constant 0 : i32
    %c0_i32_0 = arith.constant 0 : i32
    return %arg0, %c0_i32 : i32, i32
  }
  func.func @transform_3(%arg0: i32) -> (i32, i32) {
    %c0_i32 = arith.constant 0 : i32
    %c0_i32_0 = arith.constant 0 : i32
    %c0_i32_1 = arith.constant 0 : i32
    return %c0_i32, %c0_i32_0 : i32, i32
  }
}

</mosaic_0001>

<bundles_post_ra>
// kernel: tpu_custom_call.1
= control target key start
LH: loop header
LB: loop body
LE: loop exit
PB: predicated region body
PF: predicated region fallthrough
CT: control target
= control target key end

     0   :  { %8 = vsyncpa [#allocation4], 0  ;;  %s607_s0 = inlined_call_operand.hbm [shape: s8[1,128], index: 0, kind: input, shape index: {}]   ;;  %s608_s1 = inlined_call_operand.vmem [shape: f32[1,128], index: 1, kind: input, shape index: {}]   ;;  %s609_s2 = inlined_call_operand.vmem [shape: f32[1,128], index: 2, kind: input, shape index: {}]   ;;  %s610_s3 = inlined_call_operand.hbm [shape: f32[8,128], index: 3, kind: output, shape index: {}]  }
   0x1   :  { %9 = vsyncpa [#allocation5], 0 }
   0x2   :  { %14 = vsyncadd [#allocation4], 112  ;;  %s455_s12 = smov [#allocation3]   ;;  %s407_s16 = scalar_lea.hbm %s607_s0, 16 }
   0x3   :  { %s15_s13 = sshll.u32 %s455_s12, 4  ;;  %p408_p0 = scmp.ne.s32.totalorder %s607_s0, %s407_s16  ;;  %s16_s13 = int_to_ptr.vmem [resolvable:$true] %s15_s13 }
   0x4   :  { %p411_p1 = scmp.lt.u32.totalorder %s407_s16, %s607_s0 }
   0x6   :  { %p413_p2 = pnand %p411_p1, %p408_p0 }
   0x8   :  { %416 = shalt.err (!%p413_p2)
}
   0x9   :  { %s417_s21 = scalar_lea.vmem %s16_s13, 16  ;;  %s421_s22 = scalar_lea.vmem %s16_s13, 128 }
   0xa   :  { %p418_p3 = scmp.ne.s32.totalorder %s16_s13, %s417_s21  ;;  %p422_p4 = scmp.lt.s32.totalorder %s16_s13, %s16_s13 }
   0xb   :  { %p423_p5 = scmp.lt.s32.totalorder %s421_s22, %s417_s21 }
   0xd   :  { %p424_p6 = por %p423_p5, %p422_p4 }
   0xf   :  { %p425_p7 = pnand %p424_p6, %p418_p3 }
  0x11   :  { %428 = shalt.err (!%p425_p7)
}
  0x12   :  { %s456_s23 = smov 16   ;;  %s457_s24 = smov 1  }
  0x13   :  { %21 = dma.hbm_to_vmem [thread:$0]  %s607_s0, 16, %s16_s13, [#allocation4], %s456_s23, %s456_s23, %s457_s24  }
  0x14   :  { %451 = dma.done.wait [#allocation4], 128  }
  0x15   :  { %452 = vsyncadd [#allocation4], 4294967168  ;;  %v69_v0 = vld [vmem:[%s608_s1] sm:$0xff]  ;;  %v70_v1 = vld [vmem:[%s608_s1 + $0x8] sm:$0xff] }
  0x16   :  { %v71_v2 = vld [vmem:[%s608_s1 + $0x10] sm:$0xff]  ;;  %v72_v3 = vld [vmem:[%s608_s1 + $0x18] sm:$0xff]  ;;  %v129_v4 = vld [vmem:[%s609_s2] sm:$0xff]  ;;  %v73_v5 = vmul.f32 0.5, %v69_v0  ;;  %v74_v6 = vmul.f32 0.5, %v70_v1 }
  0x17   :  { %v130_v7 = vld [vmem:[%s609_s2 + $0x8] sm:$0xff]  ;;  %v75_v8 = vmul.f32 0.5, %v71_v2  ;;  %v76_v9 = vmul.f32 0.5, %v72_v3  ;;  %v131_v10 = vld [vmem:[%s609_s2 + $0x10] sm:$0xff]  ;;  %v133_v11 = vmul.f32 0.5, %v129_v4  ;;  %v132_v12 = vld [vmem:[%s609_s2 + $0x18] sm:$0xff] }
  0x18   :  { %359 = vtanh.f32 %v73_v5  ;;  %v134_v13 = vmul.f32 0.5, %v130_v7  ;;  %v37_v14 = vld [vmem:[#allocation3] sm:$0x1]  ;;  %v38_v15 = vld [vmem:[#allocation3 + $0x1] sm:$0x1]  ;;  %v135_v16 = vmul.f32 0.5, %v131_v10 }
  0x19   :  { %361 = vtanh.f32 %v74_v6  ;;  %v39_v17 = vld [vmem:[#allocation3 + $0x2] sm:$0x1]  ;;  %v40_v18 = vld [vmem:[#allocation3 + $0x3] sm:$0x1]  ;;  %v136_v19 = vmul.f32 0.5, %v132_v12  ;;  %v45_v24 = vunpack.c.0.s8 %v37_v14  ;;  %v46_v25 = vunpack.c.0.s8 %v38_v15  ;;  %s458_s2 = smov [#allocation6]  }
  0x1a   :  { %363 = vtanh.f32 %v75_v8  ;;  %v41_v20 = vld [vmem:[#allocation3 + $0x4] sm:$0x1]  ;;  %v42_v21 = vld [vmem:[#allocation3 + $0x5] sm:$0x1]  ;;  %v43_v22 = vld [vmem:[#allocation3 + $0x6] sm:$0x1]  ;;  %v47_v26 = vunpack.c.0.s8 %v39_v17  ;;  %v48_v27 = vunpack.c.0.s8 %v40_v18 }
  0x1b   :  { %365 = vtanh.f32 %v76_v9  ;;  %v44_v23 = vld [vmem:[#allocation3 + $0x7] sm:$0x1]  ;;  %v49_v28 = vunpack.c.0.s8 %v41_v20  ;;  %v50_v29 = vunpack.c.0.s8 %v42_v21  ;;  %v51_v30 = vunpack.c.0.s8 %v43_v22  ;;  %s344_s14 = sshll.u32 %s458_s2, 4  ;;  %s345_s14 = int_to_ptr.vmem [resolvable:$true] %s344_s14 }
  0x1c   :  { %367 = vtanh.f32 %v133_v11  ;;  %v52_v31 = vunpack.c.0.s8 %v44_v23  ;;  %v53_v33 = vcvt.s32.f32 %v45_v24  ;;  %v54_v34 = vcvt.s32.f32 %v46_v25  ;;  %s429_s17 = scalar_lea.vmem %s345_s14, 128  ;;  %p434_p9 = scmp.lt.s32.totalorder %s345_s14, %s345_s14 }
  0x1d   :  { %369 = vtanh.f32 %v134_v13  ;;  %v55_v36 = vcvt.s32.f32 %v47_v26  ;;  %v56_v37 = vcvt.s32.f32 %v48_v27  ;;  %v57_v40 = vcvt.s32.f32 %v49_v28  ;;  %p430_p8 = scmp.ne.s32.totalorder %s345_s14, %s429_s17  ;;  %p435_p10 = scmp.lt.s32.totalorder %s429_s17, %s429_s17 }
  0x1e   :  { %371 = vtanh.f32 %v135_v16  ;;  %v58_v41 = vcvt.s32.f32 %v50_v29  ;;  %v59_v44 = vcvt.s32.f32 %v51_v30  ;;  %v60_v45 = vcvt.s32.f32 %v52_v31 }
  0x1f   :  { %373 = vtanh.f32 %v136_v19  ;;  %v61_v49 = vmul.f32 0.5, %v53_v33  ;;  %v62_v50 = vmul.f32 0.5, %v54_v34  ;;  %v63_v54 = vmul.f32 0.5, %v55_v36  ;;  %p436_p11 = por %p435_p10, %p434_p9 }
  0x20   :  { %v64_v55 = vmul.f32 0.5, %v56_v37  ;;  %v65_v58 = vmul.f32 0.5, %v57_v40  ;;  %v66_v59 = vmul.f32 0.5, %v58_v41  ;;  %v67_v63 = vmul.f32 0.5, %v59_v44 }
  0x21   :  { %v68_v8 = vmul.f32 0.5, %v60_v45  ;;  %p437_p12 = pnand %p436_p11, %p430_p8 }
  0x22   :  { %v360_v32 = vpop.eup %359 }
  0x23   :  { %v362_v35 = vpop.eup %361  ;;  %v81_v38 = vmul.f32 0.5, %v360_v32 }
  0x24   :  { %v364_v39 = vpop.eup %363  ;;  %v82_v42 = vmul.f32 0.5, %v362_v35 }
  0x25   :  { %v366_v43 = vpop.eup %365  ;;  %v83_v46 = vmul.f32 0.5, %v364_v39  ;;  %v85_v47 = vadd.f32 0.5, %v81_v38 }
  0x26   :  { %v368_v48 = vpop.eup %367  ;;  %v84_v51 = vmul.f32 0.5, %v366_v43  ;;  %v86_v52 = vadd.f32 0.5, %v82_v42 }
  0x27   :  { %v370_v53 = vpop.eup %369  ;;  %v87_v56 = vadd.f32 0.5, %v83_v46  ;;  %v515_v57 = vmul.f32 0.3, %v85_v47  ;;  %v113_v2 = vmax.f32 %v85_v47, 1e-07  ;;  %v141_v6 = vmul.f32 0.5, %v368_v48 }
  0x28   :  { %v88_v60 = vadd.f32 0.5, %v84_v51  ;;  %v517_v61 = vmul.f32 0.3, %v86_v52  ;;  %v372_v62 = vpop.eup %371  ;;  %v142_v7 = vmul.f32 0.5, %v370_v53  ;;  %v114_v10 = vmax.f32 %v86_v52, 1e-07 }
  0x29   :  { %v519_v0 = vmul.f32 0.3, %v87_v56  ;;  %v97_v1 = vcombine.high %v515_v57, %v515_v57  ;;  %v374_v3 = vpop.eup %373  ;;  %v105_v9 = vadd.f32 %v515_v57, %v61_v49  ;;  %v115_v11 = vmax.f32 %v87_v56, 1e-07 }
  0x2a   :  { %v523_v4 = vmul.f32 0.3, %v88_v60  ;;  %v98_v5 = vcombine.high %v517_v61, %v517_v61  ;;  %v107_v14 = vadd.f32 %v517_v61, %v63_v54  ;;  %v116_v15 = vmax.f32 %v88_v60, 1e-07 }
  0x2b   :  { %v99_v12 = vcombine.high %v519_v0, %v519_v0  ;;  %v106_v13 = vadd.f32 %v97_v1, %v62_v50  ;;  %v109_v17 = vadd.f32 %v519_v0, %v65_v58  ;;  %v143_v18 = vmul.f32 0.5, %v372_v62 }
  0x2c   :  { %v100_v16 = vcombine.high %v523_v4, %v523_v4  ;;  %v144_v19 = vmul.f32 0.5, %v374_v3  ;;  %v108_v20 = vadd.f32 %v98_v5, %v64_v55  ;;  %375 = vlog2.f32 %v113_v2 }
  0x2d   :  { %v145_v21 = vadd.f32 0.5, %v141_v6  ;;  %v146_v22 = vadd.f32 0.5, %v142_v7  ;;  %v111_v23 = vadd.f32 %v523_v4, %v67_v63  ;;  %377 = vlog2.f32 %v114_v10 }
  0x2e   :  { %v147_v24 = vadd.f32 0.5, %v143_v18  ;;  %v148_v25 = vadd.f32 0.5, %v144_v19  ;;  %v110_v26 = vadd.f32 %v99_v12, %v66_v59  ;;  %379 = vlog2.f32 %v115_v11 }
  0x2f   :  { %v535_v27 = vmul.f32 0.2, %v145_v21  ;;  %v537_v28 = vmul.f32 0.2, %v146_v22  ;;  %v112_v29 = vadd.f32 %v100_v16, %v68_v8  ;;  %v173_v32 = vmax.f32 %v145_v21, 1e-07 }
  0x30   :  { %v539_v30 = vmul.f32 0.2, %v147_v24  ;;  %v541_v31 = vmul.f32 0.2, %v148_v25  ;;  %381 = vlog2.f32 %v116_v15  ;;  %v174_v39 = vmax.f32 %v146_v22, 1e-07 }
  0x31   :  { %v157_v33 = vcombine.high %v535_v27, %v535_v27  ;;  %v158_v34 = vcombine.high %v537_v28, %v537_v28  ;;  %v548_v35 = vadd.f32 %v535_v27, %v105_v9  ;;  %v551_v36 = vadd.f32 %v537_v28, %v107_v14 }
  0x32   :  { %v159_v37 = vcombine.high %v539_v30, %v539_v30  ;;  %v160_v38 = vcombine.high %v541_v31, %v541_v31  ;;  %v562_v42 = vadd.f32 %v539_v30, %v109_v17  ;;  %v175_v43 = vmax.f32 %v147_v24, 1e-07 }
  0x33   :  { %v557_v40 = vadd.f32 %v157_v33, %v106_v13  ;;  %v559_v41 = vadd.f32 %v158_v34, %v108_v20  ;;  %v176_v45 = vmax.f32 %v148_v25, 1e-07  ;;  %383 = vlog2.f32 %v173_v32 }
  0x34   :  { %v564_v44 = vadd.f32 %v159_v37, %v110_v26  ;;  %v567_v46 = vadd.f32 %v541_v31, %v111_v23  ;;  %v193_v47 = vmax.f32 %v548_v35, 1e-07  ;;  %v195_v49 = vmax.f32 %v551_v36, 1e-07 }
  0x35   :  { %v194_v48 = vmax.f32 %v557_v40, 1e-07  ;;  %v572_v50 = vadd.f32 %v160_v38, %v112_v29  ;;  %385 = vlog2.f32 %v174_v39  ;;  %v196_v51 = vmax.f32 %v559_v41, 1e-07 }
  0x36   :  { %v276_v52 = vlaneseq  ;;  %v376_v53 = vpop.eup %375  ;;  %387 = vlog2.f32 %v175_v43  ;;  %v197_v54 = vmax.f32 %v562_v42, 1e-07  ;;  %v198_v56 = vmax.f32 %v564_v44, 1e-07 }
  0x37   :  { %v378_v55 = vpop.eup %377  ;;  %389 = vlog2.f32 %v176_v45  ;;  %v199_v59 = vmax.f32 %v567_v46, 1e-07  ;;  %v201_v60 = vmin.f32 %v193_v47, 1.0  ;;  %v202_v62 = vmin.f32 %v194_v48, 1.0 }
  0x38   :  { %v380_v58 = vpop.eup %379  ;;  %v203_v63 = vmin.f32 %v195_v49, 1.0  ;;  %v200_v1 = vmax.f32 %v572_v50, 1e-07  ;;  %v204_v2 = vmin.f32 %v196_v51, 1.0  ;;  %v277_v3 = vshrl.u32 %v276_v52, 7 }
  0x39   :  { %v205_v5 = vmin.f32 %v197_v54, 1.0  ;;  %391 = vlog2.f32 %v201_v60  ;;  %v206_v7 = vmin.f32 %v198_v56, 1.0  ;;  %v207_v8 = vmin.f32 %v199_v59, 1.0 }
  0x3a   :  { %v382_v6 = vpop.eup %381  ;;  %393 = vlog2.f32 %v202_v62  ;;  %v208_v10 = vmin.f32 %v200_v1, 1.0  ;;  %v278_v11 = vadd.s32 8, %v277_v3  ;;  %v279_v13 = vadd.s32 16, %v277_v3 }
  0x3b   :  { %395 = vlog2.f32 %v203_v63  ;;  %v282_v14 = vand.u32 127, %v276_v52  ;;  %v118_v16 = vmul.f32 0.6931472, %v376_v53  ;;  %v288_v18 = vmul.u32 128, %v277_v3 }
  0x3c   :  { %397 = vlog2.f32 %v204_v2  ;;  %v289_v20 = vmul.u32 128, %v278_v11  ;;  %v120_v21 = vmul.f32 0.6931472, %v378_v55  ;;  %v280_v23 = vadd.s32 24, %v277_v3 }
  0x3d   :  { %v384_v9 = vpop.eup %383  ;;  %399 = vlog2.f32 %v205_v5  ;;  %v122_v24 = vmul.f32 0.6931472, %v380_v58  ;;  %v125_v29 = vmul.f32 %v118_v16, %v515_v57  ;;  %v290_v33 = vmul.u32 128, %v279_v13 }
  0x3e   :  { %401 = vlog2.f32 %v206_v7  ;;  %v178_v17 = vmul.f32 0.6931472, %v384_v9  ;;  %v292_v34 = vadd.s32 %v288_v18, %v282_v14  ;;  %v124_v38 = vmul.f32 0.6931472, %v382_v6 }
  0x3f   :  { %v386_v12 = vpop.eup %385  ;;  %403 = vlog2.f32 %v207_v8  ;;  %v293_v45 = vadd.s32 %v289_v20, %v282_v14  ;;  %v126_v48 = vmul.f32 %v120_v21, %v517_v61  ;;  %v291_v52 = vmul.u32 128, %v280_v23 }
  0x40   :  { %v388_v15 = vpop.eup %387  ;;  %405 = vlog2.f32 %v208_v10  ;;  %v180_v22 = vmul.f32 0.6931472, %v386_v12  ;;  %v185_v32 = vmul.f32 %v178_v17, %v535_v27  ;;  %v127_v54 = vmul.f32 %v122_v24, %v519_v0 }
  0x41   :  { %v390_v19 = vpop.eup %389  ;;  %v182_v25 = vmul.f32 0.6931472, %v388_v15  ;;  %v294_v62 = vadd.s32 %v290_v33, %v282_v14  ;;  %v128_v61 = vmul.f32 %v124_v38, %v523_v4  ;;  %vm300_vm0 = vcmp.lt.s32.totalorder %v292_v34, 128 }
  0x42   :  { %v184_v39 = vmul.f32 0.6931472, %v390_v19  ;;  %v186_v49 = vmul.f32 %v180_v22, %v537_v28  ;;  %v189_v58 = vadd.f32 %v185_v32, %v125_v29  ;;  %v295_v12 = vadd.s32 %v291_v52, %v282_v14 }
  0x43   :  { %v392_v26 = vpop.eup %391  ;;  %v187_v57 = vmul.f32 %v182_v25, %v539_v30  ;;  %vm301_vm1 = vcmp.lt.s32.totalorder %v293_v45, 128  ;;  %vm302_vm2 = vcmp.lt.s32.totalorder %v294_v62, 128 }
  0x44   :  { %v394_v37 = vpop.eup %393  ;;  %v210_v43 = vmul.f32 0.6931472, %v392_v26  ;;  %v188_v28 = vmul.f32 %v184_v39, %v541_v31  ;;  %v190_v3 = vadd.f32 %v186_v49, %v126_v48  ;;  %vm303_vm3 = vcmp.lt.s32.totalorder %v295_v12, 128 }
  0x45   :  { %v396_v47 = vpop.eup %395  ;;  %v212_v51 = vmul.f32 0.6931472, %v394_v37  ;;  %v191_v7 = vadd.f32 %v187_v57, %v127_v54 }
  0x46   :  { %v398_v53 = vpop.eup %397  ;;  %v214_v27 = vmul.f32 0.6931472, %v396_v47  ;;  %v225_v55 = vmul.f32 %v210_v43, %v548_v35  ;;  %v192_v11 = vadd.f32 %v188_v28, %v128_v61 }
  0x47   :  { %v400_v56 = vpop.eup %399  ;;  %v216_v59 = vmul.f32 0.6931472, %v398_v53  ;;  %v226_v60 = vmul.f32 %v212_v51, %v557_v40 }
  0x48   :  { %v402_v63 = vpop.eup %401  ;;  %v218_v1 = vmul.f32 0.6931472, %v400_v56  ;;  %v227_v2 = vmul.f32 %v214_v27, %v551_v36 }
  0x49   :  { %v404_v0 = vpop.eup %403  ;;  %v220_v30 = vmul.f32 0.6931472, %v402_v63  ;;  %v228_v5 = vmul.f32 %v216_v59, %v559_v41  ;;  %v241_v35 = vcombine.low %v225_v55, %v226_v60 }
  0x4a   :  { %v406_v6 = vpop.eup %405  ;;  %v222_v8 = vmul.f32 0.6931472, %v404_v0  ;;  %v229_v40 = vmul.f32 %v218_v1, %v562_v42 }
  0x4b   :  { %v224_v9 = vmul.f32 0.6931472, %v406_v6  ;;  %v230_v4 = vmul.f32 %v220_v30, %v564_v44  ;;  %v242_v10 = vcombine.low %v227_v2, %v228_v5  ;;  %v249_v31 = vsub.f32 %v189_v58, %v241_v35 }
  0x4c   :  { %v231_v36 = vmul.f32 %v222_v8, %v567_v46 }
  0x4d   :  { %v232_v13 = vmul.f32 %v224_v9, %v572_v50  ;;  %v243_v41 = vcombine.low %v229_v40, %v230_v4  ;;  %v250_v15 = vsub.f32 %v190_v3, %v242_v10  ;;  %v304_v16 = vsel %vm300_vm0, %v249_v31, 0.0 }
  0x4f   :  { %v244_v17 = vcombine.low %v231_v36, %v232_v13  ;;  %v251_v18 = vsub.f32 %v191_v7, %v243_v41  ;;  %v305_v42 = vsel %vm301_vm1, %v250_v15, 0.0 }
  0x50   :  { %v323_v19 = vadd.f32 %v305_v42, %v304_v16 }
  0x51   :  { %v252_v20 = vsub.f32 %v192_v11, %v244_v17  ;;  %v306_v44 = vsel %vm302_vm2, %v251_v18, 0.0 }
  0x52   :  { %v324_v21 = vadd.f32 %v323_v19, %v306_v44 }
  0x53   :  { %v307_v22 = vsel %vm303_vm3, %v252_v20, 0.0 }
  0x54   :  { %v325_v23 = vadd.f32 %v324_v21, %v307_v22 }
  0x56   :  { %326 = vadd.xlane.f32.xlu0 %v325_v23 }
  0xe3   :  { %v327_v46 = vpop.xlane.xlu0 %326 }
  0xe4   :  { %v328_v14 = vrot.slane %v327_v46, 4 }
  0xe6   :  { %v329_v24 = vadd.f32 %v328_v14, %v327_v46 }
  0xe8   :  { %v330_v25 = vrot.slane %v329_v24, 2 }
  0xea   :  { %v331_v50 = vadd.f32 %v330_v25, %v329_v24 }
  0xec   :  { %v332_v26 = vrot.slane %v331_v50, 1 }
  0xee   :  { %v333_v29 = vadd.f32 %v332_v26, %v331_v50 }
  0xf0   :  { %353 = vpush %v333_v29 }
 0x121   :  { %s354_s15 = spop %353 }
 0x122   :  { %s335_s16 = smul.f32 0.18033688, %s354_s15 }
 0x124   :  { %v336_v32 = vstv %s335_s16 }
 0x125   :  { %337 = vst [vmem:[#allocation6] sm:$0xff] %v336_v32 }
 0x126   :  { %440 = shalt.err (!%p437_p12)
}
 0x127   :  { %s441_s20 = scalar_lea.hbm %s610_s3, 128 }
 0x128   :  { %p442_p13 = scmp.ne.s32.totalorder %s610_s3, %s441_s20  ;;  %p445_p0 = scmp.lt.u32.totalorder %s441_s20, %s610_s3 }
 0x12a   :  { %p447_p1 = pnand %p445_p0, %p442_p13 }
 0x12c   :  { %450 = shalt.err (!%p447_p1)
}
 0x12d   :  { %347 = dma.vmem_to_hbm [thread:$0]  %s345_s14, 128, %s610_s3, [#allocation5]  }
 0x12e   :  { %453 = dma.done.wait [#allocation5], 128  }
 0x12f   :  { %454 = vsyncadd [#allocation5], 4294967168 }
 0x130   :  { %351 = vsyncpa [#allocation4], 1 }
 0x131   :  { %352 = vsyncpa [#allocation5], 1 }

</bundles_post_ra>
